<compile_context>
chip_gen: v7x
topology: tpu7x:2x2x1
jax: 0.10.0
libtpu: 0.0.40
codegen_flags: <defaults>
</compile_context>

<pallas_src>
import numpy as np
import jax
import jax.numpy as jnp
from jax.experimental import pallas as pl
from jax.experimental.pallas import tpu as pltpu


# ----------------------------------------------------------------------------
# Kernel
# ----------------------------------------------------------------------------
def _npc_kernel(params_ref, x_ref, mem_ref, out_ref):
    # params_ref : SMEM (2,) f32  -> [tau, momentum]; tau read per tile (cheap).
    # x_ref      : VMEM (tm, D)
    # mem_ref    : VMEM (tn, D)
    # out_ref    : VMEM (tm, tn)  = (x @ mem.T) / tau
    tau = params_ref[0]
    acc = jax.lax.dot_general(
        x_ref[...], mem_ref[...],
        dimension_numbers=(((1,), (1,)), ((), ())),   # contract over D (lane axis)
        preferred_element_type=jnp.float32,
    )
    out_ref[...] = (acc / tau).astype(out_ref.dtype)


# ----------------------------------------------------------------------------
# Tiling / VMEM budgeting
# ----------------------------------------------------------------------------
def _round_up(x, m):
    return ((x + m - 1) // m) * m


def _round_down(x, m):
    return (x // m) * m


def _tpu_vmem_capacity_bytes():
    """Physical VMEM per TensorCore; falls back to 128 MiB if unknown."""
    try:
        return int(pltpu.get_tpu_info().vmem_capacity_bytes)
    except Exception:
        return 128 << 20


def _choose_tiles_and_limit(B, N, D, in_itemsize, out_itemsize):
    """Pick (tm, tn) and a scoped-VMEM limit from the physical VMEM capacity.

    Double-buffered working set that BlockSpec pipelining actually allocates:
        2 * tm * Dpad * in_itemsize      (x tile)
      + 2 * tn * Dpad * in_itemsize      (memory-bank tile)
      + 2 * tm * tn * out_itemsize       (output tile)
      +     tm * tn * 4                  (f32 dot-result temp, in case the
                                          scale+cast isn't fused into the store)
    with D padded to the 128-lane width.
    """
    vmem_cap = _tpu_vmem_capacity_bytes()
    big_vmem = vmem_cap >= (96 << 20)          # v5e/v6e: 128 MiB ; v7x: 64 MiB/TC
    tile_budget = (40 << 20) if big_vmem else (20 << 20)

    d_pad = _round_up(D, 128)

    # Batch tile: full batch when it fits; otherwise a multiple-of-8 cap.
    tm_cap = 512 if big_vmem else 256
    tm = B if B <= tm_cap else tm_cap

    # Memory-bank tile: as large as the budget allows, lane-aligned.
    denom = 2 * d_pad * in_itemsize + 2 * tm * out_itemsize + 4 * tm
    avail = tile_budget - 2 * tm * d_pad * in_itemsize
    max_tn = max(avail // denom, 128)          # clamp: never negative / below 128
    tn = int(min(N, 16384, max_tn))
    if tn < N:
        tn = max(128, _round_down(tn, 128))    # lane-aligned partial-N tiles

    footprint = (2 * tm * d_pad * in_itemsize
                 + 2 * tn * d_pad * in_itemsize
                 + 2 * tm * tn * out_itemsize
                 + tm * tn * 4)
    max_limit = (64 << 20) if big_vmem else (40 << 20)
    vmem_limit = int(min(max(footprint + (4 << 20), 16 << 20), max_limit))
    return tm, tn, vmem_limit


# ----------------------------------------------------------------------------
# Wrapper
# ----------------------------------------------------------------------------
def non_parametric_classifier_forward(x, y, memory, params, *,
                                      compute_dtype=None,
                                      out_dtype=jnp.float32):
    """out = (x @ memory.T) / params[0].   (y unused in forward, API parity.)

    compute_dtype: optionally stream x / memory in bf16 (halves the bank read).
      For best effect keep a persistent bf16 copy of the bank and pass it
      directly -- casting per call re-streams the whole bank once anyway.
    out_dtype: bf16 logits halve the [B, N] output write (the largest HBM
      stream when B >= D).  Defaults keep the f32 reference numerics.
    """
    del y  # only needed by the backward/memory-update pass
    B, D = x.shape
    N, D2 = memory.shape
    assert D == D2, (D, D2)

    if compute_dtype is not None:
        if x.dtype != compute_dtype:
            x = x.astype(compute_dtype)
        if memory.dtype != compute_dtype:
            memory = memory.astype(compute_dtype)

    params = jnp.asarray(params, dtype=jnp.float32)

    in_itemsize = jnp.dtype(x.dtype).itemsize
    out_itemsize = jnp.dtype(out_dtype).itemsize
    tm, tn, vmem_limit = _choose_tiles_and_limit(B, N, D, in_itemsize, out_itemsize)

    # Grid: N-tiles outermost (sharded across TensorCores on megacore parts --
    # the win there is extra outstanding DMA, not 2x bandwidth), B-tiles
    # innermost.  The memory tile's block index is independent of the inner B
    # axis, so the bank is streamed from HBM exactly once per N sweep.
    grid_spec = pltpu.PrefetchScalarGridSpec(
        num_scalar_prefetch=0,
        grid=(pl.cdiv(N, tn), pl.cdiv(B, tm)),
        in_specs=[
            pl.BlockSpec(memory_space=pltpu.MemorySpace.SMEM),    # params (2,)
            pl.BlockSpec((tm, D), lambda j, i: (i, 0)),           # x tile
            pl.BlockSpec((tn, D), lambda j, i: (j, 0)),           # memory tile
        ],
        out_specs=pl.BlockSpec((tm, tn), lambda j, i: (i, j)),
    )

    return pl.pallas_call(
        _npc_kernel,
        out_shape=jax.ShapeDtypeStruct((B, N), out_dtype),
        grid_spec=grid_spec,
        compiler_params=pltpu.CompilerParams(
            dimension_semantics=("parallel", "parallel"),
            vmem_limit_bytes=vmem_limit),
    )(params, x, memory)


def make_npc_buffers(input_dim, output_dim, tau=1.0, momentum=0.5, seed=0):
    """Deterministic init mirroring the PyTorch __init__."""
    stdv = 1.0 / np.sqrt(input_dim / 3.0)
    key = jax.random.PRNGKey(seed)
    memory = jax.random.uniform(key, (output_dim, input_dim),
                                dtype=jnp.float32) * (2.0 * stdv) - stdv
    params = jnp.array([tau, momentum], dtype=jnp.float32)
    return memory, params


if __name__ == "__main__":
    B, D, N = 32, 64, 512          # batch, input_dim, output_dim (memory size)
    tau, momentum = 0.07, 0.5

    key = jax.random.PRNGKey(0)
    kx, ky = jax.random.split(key)
    x = jax.random.normal(kx, (B, D), dtype=jnp.float32)
    x = x / jnp.linalg.norm(x, axis=1, keepdims=True)   # unit-norm features
    y = jax.random.randint(ky, (B,), 0, N, dtype=jnp.int32)

    memory, params = make_npc_buffers(D, N, tau=tau, momentum=momentum, seed=0)

    out = non_parametric_classifier_forward(x, y, memory, params)
    out = jax.block_until_ready(out)

    # Reference check against plain JAX
    ref = (x @ memory.T) / tau
    np.testing.assert_allclose(np.asarray(out), np.asarray(ref),
                               rtol=1e-5, atol=1e-5)

    # TODO(synk): the backward pass (memory-bank index_copy_ momentum update +
    # renorm) and any downstream softmax/CE fusion are separate training-time
    # kernels, not part of this forward.
    print("KERNEL_OK")
</pallas_src>

<mosaic_0001>
module attributes {stable_mosaic.version = 11 : i64} {
  func.func @_npc_kernel(%arg0: i32, %arg1: i32, %arg2: memref<2xf32, #tpu.memory_space<smem>>, %arg3: memref<32x64xf32, #tpu.memory_space<vmem>>, %arg4: memref<512x64xf32, #tpu.memory_space<vmem>>, %arg5: memref<32x512xf32, #tpu.memory_space<vmem>>) attributes {dimension_semantics = [#tpu.dimension_semantics<parallel>, #tpu.dimension_semantics<parallel>], iteration_bounds = array<i64: 1, 1>, scalar_prefetch = 0 : i64, scratch_operands = 0 : i64, tpu.core_type = #tpu.core_type<tc>, window_params = [{transform_indices = @transform_0, window_bounds = array<i64: 2>}, {transform_indices = @transform_1, window_bounds = array<i64: 32, 64>}, {transform_indices = @transform_2, window_bounds = array<i64: 512, 64>}, {transform_indices = @transform_3, window_bounds = array<i64: 32, 512>}]} {
    %c0 = arith.constant 0 : index
    %0 = memref.load %arg2[%c0] : memref<2xf32, #tpu.memory_space<smem>>
    %c0_0 = arith.constant 0 : index
    %c0_1 = arith.constant 0 : index
    %1 = vector.load %arg3[%c0_0, %c0_1] : memref<32x64xf32, #tpu.memory_space<vmem>>, vector<32x64xf32>
    %c0_2 = arith.constant 0 : index
    %c0_3 = arith.constant 0 : index
    %2 = vector.load %arg4[%c0_2, %c0_3] : memref<512x64xf32, #tpu.memory_space<vmem>>, vector<512x64xf32>
    %cst = arith.constant dense<0.000000e+00> : vector<32x512xf32>
    %3 = tpu.matmul %1, %2, %cst {dimension_numbers = #tpu.dot_dimension_numbers<[1], [1], [0], [0], [0, 0, 1, 0], [], []>} : vector<32x64xf32>, vector<512x64xf32>, vector<32x512xf32> -> vector<32x512xf32>
    %4 = vector.broadcast %0 : f32 to vector<32x512xf32>
    %5 = arith.divf %3, %4 : vector<32x512xf32>
    %c0_4 = arith.constant 0 : index
    %c0_5 = arith.constant 0 : index
    %6 = vector.load %arg5[%c0_4, %c0_5] : memref<32x512xf32, #tpu.memory_space<vmem>>, vector<32x512xf32>
    tpu.vector_store %arg5[%c0_4, %c0_5], %5 {strides = array<i32>} : memref<32x512xf32, #tpu.memory_space<vmem>>, vector<32x512xf32>,
    return
  }
  func.func @transform_0(%arg0: i32, %arg1: i32) -> i32 {
    %c0_i32 = arith.constant 0 : i32
    %c0_i32_0 = arith.constant 0 : i32
    return %c0_i32 : i32
  }
  func.func @transform_1(%arg0: i32, %arg1: i32) -> (i32, i32) {
    %c0_i32 = arith.constant 0 : i32
    %c0_i32_0 = arith.constant 0 : i32
    return %arg1, %c0_i32 : i32, i32
  }
  func.func @transform_2(%arg0: i32, %arg1: i32) -> (i32, i32) {
    %c0_i32 = arith.constant 0 : i32
    %c0_i32_0 = arith.constant 0 : i32
    return %arg0, %c0_i32 : i32, i32
  }
  func.func @transform_3(%arg0: i32, %arg1: i32) -> (i32, i32) {
    %c0_i32 = arith.constant 0 : i32
    return %arg1, %arg0 : i32, i32
  }
}

</mosaic_0001>

<bundles_post_ra>
// kernel: tpu_custom_call.1
= control target key start
LH: loop header
LB: loop body
LE: loop exit
PB: predicated region body
PF: predicated region fallthrough
CT: control target
= control target key end

     0   :  { %8 = vsyncpa [#allocation4], 0  ;;  %s1158_s0 = inlined_call_operand.vmem [shape: f32[2], index: 0, kind: input, shape index: {}]   ;;  %s1159_s1 = inlined_call_operand.vmem [shape: f32[32,64], index: 1, kind: input, shape index: {}]   ;;  %s1160_s2 = inlined_call_operand.vmem [shape: f32[512,64], index: 2, kind: input, shape index: {}]   ;;  %s1161_s3 = inlined_call_operand.hbm [shape: f32[32,512], index: 3, kind: output, shape index: {}]  }
   0x1   :  { %9 = vsyncpa [#allocation3], 0  ;;  %s16_s14 = sshll.u32 %s1158_s0, 4  ;;  %s17_s14 = int_to_ptr.vmem [resolvable:$true] %s16_s14 }
   0x2   :  { %s785_s15 = scalar_lea.vmem %s17_s14, 16  ;;  %p790_p1 = scmp.lt.s32.totalorder %s17_s14, %s17_s14 }
   0x3   :  { %p786_p0 = scmp.ne.s32.totalorder %s17_s14, %s785_s15  ;;  %p791_p2 = scmp.lt.s32.totalorder %s785_s15, %s785_s15 }
   0x5   :  { %p792_p3 = por %p791_p2, %p790_p1 }
   0x7   :  { %p793_p4 = pnand %p792_p3, %p786_p0 }
   0x9   :  { %796 = shalt.err (!%p793_p4)
}
   0xa   :  { %s823_s16 = smov [#allocation2]  }
   0xb   :  { %19 = dma.vmem_to_smem %s17_s14, 16, %s823_s16, [#allocation4]  }
   0xc   :  { %819 = dma.done.wait [#allocation4], 16  }
   0xd   :  { %820 = vsyncadd [#allocation4], 4294967280 }
   0xe   :  { %27 = sfence }
   0xf   :  { %v49_v0 = vld [vmem:[%s1160_s2 + $0x80] sm:$0xff]  ;;  %v50_v1 = vld [vmem:[%s1160_s2 + $0x88] sm:$0xff]  ;;  %vm97_vm0 = vcmask 523264   ;;  %v51_v13 = vld [vmem:[%s1160_s2 + $0x90] sm:$0xff]  ;;  %s28_s12 = sld [smem:[#allocation2]] }
  0x10   :  { %v81_v2 = vld [vmem:[%s1160_s2 + $0x180] sm:$0xff]  ;;  %v683_v3 = vpack.c.bf16 %v50_v1, %v49_v0  ;;  %vm861_vm1 = vmpackc.low %vm97_vm0, %vm97_vm0  ;;  %v82_v5 = vld [vmem:[%s1160_s2 + $0x188] sm:$0xff] }
  0x11   :  { %v33_v6 = vld [vmem:[%s1160_s2] sm:$0xff]  ;;  %v731_v7 = vpack.c.bf16 %v82_v5, %v81_v2  ;;  %v34_v8 = vld [vmem:[%s1160_s2 + $0x8] sm:$0xff]  ;;  %v52_v14 = vld [vmem:[%s1160_s2 + $0x98] sm:$0xff] }
  0x12   :  { %v65_v9 = vld [vmem:[%s1160_s2 + $0x100] sm:$0xff]  ;;  %v66_v10 = vld [vmem:[%s1160_s2 + $0x108] sm:$0xff]  ;;  %685 = vmatprep.subr.msk.bf16.mxu0 %vm861_vm1, %v683_v3  ;;  %v686_v11 = vpack.c.bf16 %v34_v8, %v33_v6  ;;  %v83_v15 = vld [vmem:[%s1160_s2 + $0x190] sm:$0xff]  ;;  %v689_v16 = vpack.c.bf16 %v52_v14, %v51_v13 }
  0x13   :  { %v734_v12 = vpack.c.bf16 %v66_v10, %v65_v9  ;;  %733 = vmatprep.subr.msk.bf16.mxu1 %vm861_vm1, %v731_v7  ;;  %v84_v17 = vld [vmem:[%s1160_s2 + $0x198] sm:$0xff]  ;;  %v35_v19 = vld [vmem:[%s1160_s2 + $0x10] sm:$0xff]  ;;  %v53_v23 = vld [vmem:[%s1160_s2 + $0xa0] sm:$0xff] }
  0x14   :  { %688 = vmatpush3.bf16.xpose.msk.msra.mxu0 %vm861_vm1, %v686_v11  ;;  %v737_v18 = vpack.c.bf16 %v84_v17, %v83_v15  ;;  %v36_v20 = vld [vmem:[%s1160_s2 + $0x18] sm:$0xff]  ;;  %v67_v21 = vld [vmem:[%s1160_s2 + $0x110] sm:$0xff]  ;;  %v54_v24 = vld [vmem:[%s1160_s2 + $0xa8] sm:$0xff] }
  0x15   :  { %736 = vmatpush3.bf16.xpose.msk.msra.mxu1 %vm861_vm1, %v734_v12  ;;  %691 = vmatprep.subr.msk.bf16.mxu0 %vm861_vm1, %v689_v16  ;;  %v68_v22 = vld [vmem:[%s1160_s2 + $0x118] sm:$0xff]  ;;  %v85_v25 = vld [vmem:[%s1160_s2 + $0x1a0] sm:$0xff]  ;;  %v86_v26 = vld [vmem:[%s1160_s2 + $0x1a8] sm:$0xff]  ;;  %v692_v27 = vpack.c.bf16 %v36_v20, %v35_v19  ;;  %v695_v29 = vpack.c.bf16 %v54_v24, %v53_v23 }
  0x16   :  { %739 = vmatprep.subr.msk.bf16.mxu1 %vm861_vm1, %v737_v18  ;;  %v740_v28 = vpack.c.bf16 %v68_v22, %v67_v21  ;;  %v743_v30 = vpack.c.bf16 %v86_v26, %v85_v25  ;;  %v37_v31 = vld [vmem:[%s1160_s2 + $0x20] sm:$0xff]  ;;  %v38_v32 = vld [vmem:[%s1160_s2 + $0x28] sm:$0xff]  ;;  %v55_v35 = vld [vmem:[%s1160_s2 + $0xb0] sm:$0xff] }
  0x17   :  { %v69_v33 = vld [vmem:[%s1160_s2 + $0x120] sm:$0xff]  ;;  %v70_v34 = vld [vmem:[%s1160_s2 + $0x128] sm:$0xff]  ;;  %v56_v36 = vld [vmem:[%s1160_s2 + $0xb8] sm:$0xff]  ;;  %v698_v39 = vpack.c.bf16 %v38_v32, %v37_v31 }
  0x18   :  { %v87_v37 = vld [vmem:[%s1160_s2 + $0x1b0] sm:$0xff]  ;;  %v88_v38 = vld [vmem:[%s1160_s2 + $0x1b8] sm:$0xff]  ;;  %v746_v40 = vpack.c.bf16 %v70_v34, %v69_v33  ;;  %v701_v41 = vpack.c.bf16 %v56_v36, %v55_v35  ;;  %v973_v45 = vld [vmem:[%s1159_s1] sm:$0xff] }
  0x19   :  { %v749_v42 = vpack.c.bf16 %v88_v38, %v87_v37  ;;  %v39_v43 = vld [vmem:[%s1160_s2 + $0x30] sm:$0xff]  ;;  %v40_v44 = vld [vmem:[%s1160_s2 + $0x38] sm:$0xff]  ;;  %v57_v48 = vld [vmem:[%s1160_s2 + $0xc0] sm:$0xff]  ;;  %635 = vmatprep.mubr.msk.f32.mxu0 %vm97_vm0, %v973_v45  ;;  %675 = vmatprep.mubr.msk.f32.mxu1 %vm97_vm0, %v973_v45  ;;  %v480_v37 = vstv %s28_s12 }
  0x1a   :  { %v71_v46 = vld [vmem:[%s1160_s2 + $0x130] sm:$0xff]  ;;  %v72_v47 = vld [vmem:[%s1160_s2 + $0x138] sm:$0xff]  ;;  %v58_v49 = vld [vmem:[%s1160_s2 + $0xc8] sm:$0xff]  ;;  %v704_v52 = vpack.c.bf16 %v40_v44, %v39_v43  ;;  %783 = vrcp.f32 %v480_v37 }
  0x1b   :  { %v89_v50 = vld [vmem:[%s1160_s2 + $0x1c0] sm:$0xff]  ;;  %v90_v51 = vld [vmem:[%s1160_s2 + $0x1c8] sm:$0xff]  ;;  %v752_v53 = vpack.c.bf16 %v72_v47, %v71_v46  ;;  %v707_v54 = vpack.c.bf16 %v58_v49, %v57_v48  ;;  %v59_v60 = vld [vmem:[%s1160_s2 + $0xd0] sm:$0xff] }
  0x1c   :  { %694 = vmatpush3.bf16.xpose.msk.msra.mxu0 %vm861_vm1, %v692_v27  ;;  %v755_v55 = vpack.c.bf16 %v90_v51, %v89_v50  ;;  %v41_v56 = vld [vmem:[%s1160_s2 + $0x40] sm:$0xff]  ;;  %v42_v57 = vld [vmem:[%s1160_s2 + $0x48] sm:$0xff]  ;;  %v60_v61 = vld [vmem:[%s1160_s2 + $0xd8] sm:$0xff] }
  0x1d   :  { %742 = vmatpush3.bf16.xpose.msk.msra.mxu1 %vm861_vm1, %v740_v28  ;;  %697 = vmatprep.subr.msk.bf16.mxu0 %vm861_vm1, %v695_v29  ;;  %v73_v58 = vld [vmem:[%s1160_s2 + $0x140] sm:$0xff]  ;;  %v74_v59 = vld [vmem:[%s1160_s2 + $0x148] sm:$0xff]  ;;  %v91_v62 = vld [vmem:[%s1160_s2 + $0x1d0] sm:$0xff]  ;;  %v710_v0 = vpack.c.bf16 %v42_v57, %v41_v56  ;;  %v713_v2 = vpack.c.bf16 %v60_v61, %v59_v60 }
  0x1e   :  { %745 = vmatprep.subr.msk.bf16.mxu1 %vm861_vm1, %v743_v30  ;;  %v92_v63 = vld [vmem:[%s1160_s2 + $0x1d8] sm:$0xff]  ;;  %v758_v1 = vpack.c.bf16 %v74_v59, %v73_v58  ;;  %v43_v5 = vld [vmem:[%s1160_s2 + $0x50] sm:$0xff]  ;;  %v61_v9 = vld [vmem:[%s1160_s2 + $0xe0] sm:$0xff] }
  0x1f   :  { %v761_v3 = vpack.c.bf16 %v92_v63, %v91_v62  ;;  %v44_v6 = vld [vmem:[%s1160_s2 + $0x58] sm:$0xff]  ;;  %v75_v7 = vld [vmem:[%s1160_s2 + $0x150] sm:$0xff]  ;;  %v62_v10 = vld [vmem:[%s1160_s2 + $0xe8] sm:$0xff] }
  0x20   :  { %v76_v8 = vld [vmem:[%s1160_s2 + $0x158] sm:$0xff]  ;;  %v93_v11 = vld [vmem:[%s1160_s2 + $0x1e0] sm:$0xff]  ;;  %v94_v12 = vld [vmem:[%s1160_s2 + $0x1e8] sm:$0xff]  ;;  %v716_v13 = vpack.c.bf16 %v44_v6, %v43_v5  ;;  %v719_v15 = vpack.c.bf16 %v62_v10, %v61_v9 }
  0x21   :  { %v764_v14 = vpack.c.bf16 %v76_v8, %v75_v7  ;;  %v767_v16 = vpack.c.bf16 %v94_v12, %v93_v11  ;;  %v45_v17 = vld [vmem:[%s1160_s2 + $0x60] sm:$0xff]  ;;  %v46_v18 = vld [vmem:[%s1160_s2 + $0x68] sm:$0xff]  ;;  %v63_v21 = vld [vmem:[%s1160_s2 + $0xf0] sm:$0xff] }
  0x22   :  { %v77_v19 = vld [vmem:[%s1160_s2 + $0x160] sm:$0xff]  ;;  %v78_v20 = vld [vmem:[%s1160_s2 + $0x168] sm:$0xff]  ;;  %v64_v22 = vld [vmem:[%s1160_s2 + $0xf8] sm:$0xff]  ;;  %v722_v25 = vpack.c.bf16 %v46_v18, %v45_v17 }
  0x23   :  { %v95_v23 = vld [vmem:[%s1160_s2 + $0x1f0] sm:$0xff]  ;;  %v96_v24 = vld [vmem:[%s1160_s2 + $0x1f8] sm:$0xff]  ;;  %v770_v26 = vpack.c.bf16 %v78_v20, %v77_v19  ;;  %v725_v27 = vpack.c.bf16 %v64_v22, %v63_v21  ;;  %v30_v35 = vld [vmem:[%s1159_s1 + $0x8] sm:$0xff] }
  0x24   :  { %700 = vmatpush3.bf16.xpose.msk.msra.mxu0 %vm861_vm1, %v698_v39  ;;  %v773_v28 = vpack.c.bf16 %v96_v24, %v95_v23  ;;  %v47_v29 = vld [vmem:[%s1160_s2 + $0x70] sm:$0xff]  ;;  %v48_v30 = vld [vmem:[%s1160_s2 + $0x78] sm:$0xff]  ;;  %v784_v38 = vpop.eup %783 }
  0x25   :  { %748 = vmatpush3.bf16.xpose.msk.msra.mxu1 %vm861_vm1, %v746_v40  ;;  %703 = vmatprep.subr.msk.bf16.mxu0 %vm861_vm1, %v701_v41  ;;  %v79_v31 = vld [vmem:[%s1160_s2 + $0x170] sm:$0xff]  ;;  %v80_v32 = vld [vmem:[%s1160_s2 + $0x178] sm:$0xff]  ;;  %v728_v33 = vpack.c.bf16 %v48_v30, %v47_v29 }
  0x26   :  { %751 = vmatprep.subr.msk.bf16.mxu1 %vm861_vm1, %v749_v42  ;;  %v776_v34 = vpack.c.bf16 %v80_v32, %v79_v31  ;;  %v31_v36 = vld [vmem:[%s1159_s1 + $0x10] sm:$0xff]  ;;  %v32_v4 = vld [vmem:[%s1159_s1 + $0x18] sm:$0xff]  ;;  %s824_s1 = smov [#allocation5]  }
  0x27   :  { %s519_s13 = sshll.u32 %s824_s1, 4  ;;  %s520_s13 = int_to_ptr.vmem [resolvable:$true] %s519_s13 }
  0x28   :  { %s797_s14 = scalar_lea.vmem %s520_s13, 2048  ;;  %p802_p6 = scmp.lt.s32.totalorder %s520_s13, %s520_s13 }
  0x29   :  { %p798_p5 = scmp.ne.s32.totalorder %s520_s13, %s797_s14  ;;  %p803_p7 = scmp.lt.s32.totalorder %s797_s14, %s797_s14 }
  0x2b   :  { %p804_p8 = por %p803_p7, %p802_p6 }
  0x2c   :  { %706 = vmatpush3.bf16.xpose.msk.msra.mxu0 %vm861_vm1, %v704_v52 }
  0x2d   :  { %754 = vmatpush3.bf16.xpose.msk.msra.mxu1 %vm861_vm1, %v752_v53  ;;  %709 = vmatprep.subr.msk.bf16.mxu0 %vm861_vm1, %v707_v54  ;;  %p805_p9 = pnand %p804_p8, %p798_p5 }
  0x2e   :  { %757 = vmatprep.subr.msk.bf16.mxu1 %vm861_vm1, %v755_v55 }
  0x34   :  { %712 = vmatpush3.bf16.xpose.msk.msra.mxu0 %vm861_vm1, %v710_v0 }
  0x35   :  { %760 = vmatpush3.bf16.xpose.msk.msra.mxu1 %vm861_vm1, %v758_v1  ;;  %715 = vmatprep.subr.msk.bf16.mxu0 %vm861_vm1, %v713_v2 }
  0x36   :  { %763 = vmatprep.subr.msk.bf16.mxu1 %vm861_vm1, %v761_v3 }
  0x3c   :  { %718 = vmatpush3.bf16.xpose.msk.msra.mxu0 %vm861_vm1, %v716_v13 }
  0x3d   :  { %766 = vmatpush3.bf16.xpose.msk.msra.mxu1 %vm861_vm1, %v764_v14  ;;  %721 = vmatprep.subr.msk.bf16.mxu0 %vm861_vm1, %v719_v15 }
  0x3e   :  { %769 = vmatprep.subr.msk.bf16.mxu1 %vm861_vm1, %v767_v16 }
  0x44   :  { %724 = vmatpush3.bf16.xpose.msk.msra.mxu0 %vm861_vm1, %v722_v25 }
  0x45   :  { %772 = vmatpush3.bf16.xpose.msk.msra.mxu1 %vm861_vm1, %v770_v26  ;;  %727 = vmatprep.subr.msk.bf16.mxu0 %vm861_vm1, %v725_v27 }
  0x46   :  { %775 = vmatprep.subr.msk.bf16.mxu1 %vm861_vm1, %v773_v28 }
  0x4c   :  { %730 = vmatpush3.bf16.xpose.msk.msra.mxu0 %vm861_vm1, %v728_v33 }
  0x4d   :  { %778 = vmatpush3.bf16.xpose.msk.msra.mxu1 %vm861_vm1, %v776_v34 }
  0x53   :  { %636 = vmatmul.mubr.msk.f32.vlgmr.msra.gmra.mrb[0].mxu0 %vm97_vm0, %v973_v45 }
  0x54   :  { %676 = vmatmul.mubr.msk.f32.vlgmr.msra.gmra.mrb[0].mxu1 %vm97_vm0, %v973_v45  ;;  %637 = vmatprep.mubr.msk.f32.mxu0 %vm97_vm0, %v30_v35 }
  0x55   :  { %677 = vmatprep.mubr.msk.f32.mxu1 %vm97_vm0, %v30_v35 }
  0x57   :  { %638 = vmatmul.mubr.msk.f32.gmra.mrb[2].mxu0 %vm97_vm0, %v30_v35 }
  0x58   :  { %678 = vmatmul.mubr.msk.f32.gmra.mrb[2].mxu1 %vm97_vm0, %v30_v35  ;;  %639 = vmatprep.mubr.msk.f32.mxu0 %vm97_vm0, %v31_v36 }
  0x59   :  { %679 = vmatprep.mubr.msk.f32.mxu1 %vm97_vm0, %v31_v36 }
  0x5b   :  { %640 = vmatmul.mubr.msk.f32.gmra.mrb[4].mxu0 %vm97_vm0, %v31_v36 }
  0x5c   :  { %680 = vmatmul.mubr.msk.f32.gmra.mrb[4].mxu1 %vm97_vm0, %v31_v36  ;;  %641 = vmatprep.mubr.msk.f32.mxu0 %vm97_vm0, %v32_v4 }
  0x5d   :  { %681 = vmatprep.mubr.msk.f32.mxu1 %vm97_vm0, %v32_v4 }
  0x5f   :  { %642 = vmatmul.mubr.msk.f32.gmra.mrb[6].mxu0 %vm97_vm0, %v32_v4 }
  0x60   :  { %682 = vmatmul.mubr.msk.f32.gmra.mrb[6].mxu1 %vm97_vm0, %v32_v4 }
 0x126   :  { %v368_v39 = vpop.f32.mrb[0].mxu0 }
 0x127   :  { %v457_v40 = vpop.f32.mrb[0].mxu1  ;;  %v482_v41 = vmul.f32 %v784_v38, %v368_v39  ;;  %v370_v43 = vpop.f32.mrb[1].mxu0 }
 0x128   :  { %v484_v42 = vmul.f32 %v784_v38, %v457_v40  ;;  %v459_v44 = vpop.f32.mrb[1].mxu1  ;;  %v483_v45 = vmul.f32 %v784_v38, %v370_v43 }
 0x129   :  { %v485_v46 = vmul.f32 %v784_v38, %v459_v44  ;;  %498 = vst [vmem:[#allocation5] sm:$0xff] %v482_v41 }
 0x12a   :  { %500 = vst [vmem:[#allocation5 + $0x10] sm:$0xff] %v484_v42  ;;  %499 = vst [vmem:[#allocation5 + $0x8] sm:$0xff] %v483_v45  ;;  %v374_v47 = vpop.f32.mrb[2].mxu0 }
 0x12b   :  { %501 = vst [vmem:[#allocation5 + $0x18] sm:$0xff] %v485_v46  ;;  %v463_v48 = vpop.f32.mrb[2].mxu1  ;;  %v486_v49 = vmul.f32 %v784_v38, %v374_v47  ;;  %v376_v51 = vpop.f32.mrb[3].mxu0 }
 0x12c   :  { %v488_v50 = vmul.f32 %v784_v38, %v463_v48  ;;  %v465_v52 = vpop.f32.mrb[3].mxu1  ;;  %v487_v53 = vmul.f32 %v784_v38, %v376_v51 }
 0x12d   :  { %v489_v54 = vmul.f32 %v784_v38, %v465_v52  ;;  %502 = vst [vmem:[#allocation5 + $0x20] sm:$0xff] %v486_v49 }
 0x12e   :  { %504 = vst [vmem:[#allocation5 + $0x30] sm:$0xff] %v488_v50  ;;  %503 = vst [vmem:[#allocation5 + $0x28] sm:$0xff] %v487_v53  ;;  %v380_v55 = vpop.f32.mrb[4].mxu0 }
 0x12f   :  { %505 = vst [vmem:[#allocation5 + $0x38] sm:$0xff] %v489_v54  ;;  %v469_v56 = vpop.f32.mrb[4].mxu1  ;;  %v490_v57 = vmul.f32 %v784_v38, %v380_v55  ;;  %v382_v59 = vpop.f32.mrb[5].mxu0 }
 0x130   :  { %v492_v58 = vmul.f32 %v784_v38, %v469_v56  ;;  %v471_v60 = vpop.f32.mrb[5].mxu1  ;;  %v491_v61 = vmul.f32 %v784_v38, %v382_v59 }
 0x131   :  { %v493_v62 = vmul.f32 %v784_v38, %v471_v60  ;;  %506 = vst [vmem:[#allocation5 + $0x40] sm:$0xff] %v490_v57 }
 0x132   :  { %508 = vst [vmem:[#allocation5 + $0x50] sm:$0xff] %v492_v58  ;;  %507 = vst [vmem:[#allocation5 + $0x48] sm:$0xff] %v491_v61  ;;  %v386_v63 = vpop.f32.mrb[6].mxu0 }
 0x133   :  { %509 = vst [vmem:[#allocation5 + $0x58] sm:$0xff] %v493_v62  ;;  %v475_v0 = vpop.f32.mrb[6].mxu1  ;;  %v494_v1 = vmul.f32 %v784_v38, %v386_v63  ;;  %v388_v3 = vpop.f32.mrb[7].mxu0 }
 0x134   :  { %v496_v2 = vmul.f32 %v784_v38, %v475_v0  ;;  %v477_v5 = vpop.f32.mrb[7].mxu1  ;;  %v495_v6 = vmul.f32 %v784_v38, %v388_v3 }
 0x135   :  { %v497_v7 = vmul.f32 %v784_v38, %v477_v5  ;;  %510 = vst [vmem:[#allocation5 + $0x60] sm:$0xff] %v494_v1 }
 0x136   :  { %512 = vst [vmem:[#allocation5 + $0x70] sm:$0xff] %v496_v2  ;;  %511 = vst [vmem:[#allocation5 + $0x68] sm:$0xff] %v495_v6 }
 0x137   :  { %513 = vst [vmem:[#allocation5 + $0x78] sm:$0xff] %v497_v7 }
 0x138   :  { %808 = shalt.err (!%p805_p9)
}
 0x139   :  { %s809_s17 = scalar_lea.hbm %s1161_s3, 2048 }
 0x13a   :  { %p810_p10 = scmp.ne.s32.totalorder %s1161_s3, %s809_s17  ;;  %p813_p11 = scmp.lt.u32.totalorder %s809_s17, %s1161_s3 }
 0x13c   :  { %p815_p12 = pnand %p813_p11, %p810_p10 }
 0x13e   :  { %818 = shalt.err (!%p815_p12)
}
 0x13f   :  { %s825_s21 = smov 512   ;;  %s826_s22 = smov 32  }
 0x140   :  { %525 = dma.vmem_to_hbm [thread:$0]  %s520_s13, 2048, %s1161_s3, [#allocation3], %s825_s21, %s825_s21, %s826_s22  }
 0x141   :  { %821 = dma.done.wait [#allocation3], 2048  }
 0x142   :  { %822 = vsyncadd [#allocation3], 4294965248 }
 0x143   :  { %529 = vsyncpa [#allocation3], 1 }
 0x144   :  { %530 = vsyncpa [#allocation4], 1 }

</bundles_post_ra>
